<compile_context>
chip_gen: v5e
topology: v5e:2x2
jax: 0.10.0
libtpu: 0.0.40
codegen_flags: <defaults>
</compile_context>

<pallas_src>
import functools

import jax
import jax.numpy as jnp
from jax.experimental import pallas as pl
from jax.experimental.pallas import tpu as pltpu


def _block_kernel(x_ref,                         # (M, C) activations, M = Bc*T
                  g1_ref, be1_ref,               # LayerNorm 1 gamma/beta, (1, C)
                  wq_ref, wk_ref, wv_ref,        # head-major weights, (H, C, hs); scale in wq
                  wp_ref, bp_ref,                # output projection, (H, hs, C), (1, C)
                  g2_ref, be2_ref,               # LayerNorm 2 gamma/beta, (1, C)
                  w1_ref, bb1_ref,               # FFN first linear, (C, 4C), (1, 4C)
                  w2_ref, bb2_ref,               # FFN second linear, (4C, C), (1, C)
                  o_ref,                         # (M, C)
                  *, n_heads, seq_len, eps, mxu_dtype):
    x = x_ref[...]                               # (M, C), f32
    M, C = x.shape
    T = seq_len

    def mdot(a, b):                              # 2-D matmul: bf16 operands, f32 accumulate
        return jnp.dot(a.astype(mxu_dtype), b.astype(mxu_dtype),
                       preferred_element_type=jnp.float32)

    def bdot(a, b, ca, cb):                      # head-batched matmul (batch dim 0)
        return jax.lax.dot_general(
            a.astype(mxu_dtype), b.astype(mxu_dtype),
            dimension_numbers=(((ca,), (cb,)), ((0,), (0,))),
            preferred_element_type=jnp.float32)

    def layer_norm(z, g, b):                     # f32 vector math
        mu = jnp.mean(z, axis=-1, keepdims=True)
        var = jnp.mean((z - mu) ** 2, axis=-1, keepdims=True)
        return (z - mu) * jax.lax.rsqrt(var + eps) * g + b

    # ---- LayerNorm 1 ----
    xn = layer_norm(x, g1_ref[0], be1_ref[0])

    # ---- Head-major Q/K/V: one activation broadcast, three head-batched matmuls.
    #      (No lane slicing: each head's q/k/v is produced directly as its own slab.)
    xb = jnp.broadcast_to(xn.astype(mxu_dtype), (n_heads, M, C))
    q = bdot(xb, wq_ref[...], 2, 1)              # (H, M, hs); C**-0.5 scale folded into wq
    k = bdot(xb, wk_ref[...], 2, 1)              # (H, M, hs)
    v = bdot(xb, wv_ref[...], 2, 1)              # (H, M, hs)

    # ---- Scores + in-kernel causal / block-diagonal mask over the folded (batch*time) axis.
    s = bdot(q, k, 2, 2)                         # (H, M, M), f32
    row = jax.lax.broadcasted_iota(jnp.int32, (M, M), 0)
    col = jax.lax.broadcasted_iota(jnp.int32, (M, M), 1)
    # row // T computed in f32 (VPU has no vector integer divide); +0.5 keeps floor()
    # safely away from integer boundaries.
    inv_t = 1.0 / float(T)
    row_blk = jnp.floor((row.astype(jnp.float32) + 0.5) * inv_t)
    col_blk = jnp.floor((col.astype(jnp.float32) + 0.5) * inv_t)
    mask = jnp.logical_and(col <= row, row_blk == col_blk)        # (M, M)
    s = jnp.where(mask[None, :, :], s, -1e30)    # finite fill: never produces NaN rows

    # ---- Softmax (f32; EUP approximate reciprocal for the denominator) ----
    p = jnp.exp(s - jnp.max(s, axis=-1, keepdims=True))
    p = p * pl.reciprocal(jnp.sum(p, axis=-1, keepdims=True), approx=True)

    # ---- Attention output + output projection (no concat; per-head proj summed over heads)
    head_out = bdot(p, v, 2, 1)                                   # (H, M, hs)
    proj = jnp.sum(bdot(head_out, wp_ref[...], 2, 1), axis=0)     # (M, C)
    x1 = x + proj + bp_ref[0]                                     # residual 1

    # ---- LayerNorm 2 + FeedForward: Linear(C,4C) -> ReLU -> Linear(4C,C) ----
    xn2 = layer_norm(x1, g2_ref[0], be2_ref[0])
    h1 = jnp.maximum(mdot(xn2, w1_ref[...]) + bb1_ref[0], 0.0)
    o_ref[...] = x1 + mdot(h1, w2_ref[...]) + bb2_ref[0]          # residual 2


def gpt_block(x, params, *, n_heads, batch_chunks=1, mxu_dtype=jnp.bfloat16):
    """One transformer Block (eval mode).

    batch_chunks=1: single grid step (right choice for 1-TC v5e/v6e and for small M).
    batch_chunks=2: "parallel" batch axis so v7x's two TensorCores split the work --
                    only worth it when each chunk has >= ~256 rows.
    mxu_dtype: matmul-operand dtype (bf16 default = native MXU rate on v5e/v6e/v7x);
               pass jnp.float32 for exact-reference matmuls.
    """
    B, T, C = x.shape
    assert C % n_heads == 0 and B % batch_chunks == 0
    Bc = B // batch_chunks
    M = Bc * T
    hs = C // n_heads
    # NOTE: reference scales scores by emb_dim ** -0.5 (C), not head_size ** -0.5.
    scale = float(C) ** (-0.5)

    (g1, be1, wq, wk, wv, wp, bp, g2, be2, w1, bb1, w2, bb2) = params

    def to_heads(w):                             # (C, H*hs) -> (H, C, hs)
        return jnp.transpose(w.reshape(C, n_heads, hs), (1, 0, 2))

    # Host-side weight re-layout: head-major Q/K/V (scale folded into Q), head-major proj,
    # and all MXU weight operands narrowed to mxu_dtype. LN params & biases stay f32.
    wq_h = to_heads(wq * scale).astype(mxu_dtype)
    wk_h = to_heads(wk).astype(mxu_dtype)
    wv_h = to_heads(wv).astype(mxu_dtype)
    wp_h = wp.reshape(n_heads, hs, C).astype(mxu_dtype)
    w1c = w1.astype(mxu_dtype)
    w2c = w2.astype(mxu_dtype)

    # Fold batch & time into one matmul M dimension.
    x2d = x.reshape(B * T, C)

    kernel = functools.partial(_block_kernel, n_heads=n_heads, seq_len=T,
                               eps=1e-5, mxu_dtype=mxu_dtype)

    def rep(shape):   # grid-invariant operand (weights / biases)
        return pl.BlockSpec(shape, lambda i, _s=shape: (0,) * len(_s))

    grid_spec = pltpu.PrefetchScalarGridSpec(
        num_scalar_prefetch=0,
        grid=(batch_chunks,),
        in_specs=[
            pl.BlockSpec((M, C), lambda i: (i, 0)),               # x (chunk of rows)
            rep((1, C)), rep((1, C)),                             # ln1 gamma/beta
            rep((n_heads, C, hs)),                                # Wq (head-major, scaled)
            rep((n_heads, C, hs)),                                # Wk
            rep((n_heads, C, hs)),                                # Wv
            rep((n_heads, hs, C)), rep((1, C)),                   # Wproj, bproj
            rep((1, C)), rep((1, C)),                             # ln2 gamma/beta
            rep((C, 4 * C)), rep((1, 4 * C)),                     # FFN W1, b1
            rep((4 * C, C)), rep((1, C)),                         # FFN W2, b2
        ],
        out_specs=pl.BlockSpec((M, C), lambda i: (i, 0)),
    )

    out2d = pl.pallas_call(
        kernel,
        out_shape=jax.ShapeDtypeStruct((B * T, C), jnp.float32),
        grid_spec=grid_spec,
        compiler_params=pltpu.CompilerParams(dimension_semantics=("parallel",)),
    )(x2d, g1, be1, wq_h, wk_h, wv_h, wp_h, bp, g2, be2, w1c, bb1, w2c, bb2)
    return out2d.reshape(B, T, C)


def reference_block(x, params, *, n_heads):
    """Pure-JAX f32 reference mirroring the PyTorch module (eval mode)."""
    B, T, C = x.shape
    hs = C // n_heads
    (g1, be1, wq, wk, wv, wp, bp, g2, be2, w1, bb1, w2, bb2) = params

    def ln(z, g, b):
        mu = jnp.mean(z, axis=-1, keepdims=True)
        var = jnp.mean((z - mu) ** 2, axis=-1, keepdims=True)
        return (z - mu) / jnp.sqrt(var + 1e-5) * g[0] + b[0]

    xn = ln(x, g1, be1)
    q = xn @ wq
    k = xn @ wk
    v = xn @ wv
    mask = jnp.tril(jnp.ones((T, T), bool))
    heads = []
    for h in range(n_heads):
        sl = slice(h * hs, (h + 1) * hs)
        s = q[..., sl] @ jnp.swapaxes(k[..., sl], -1, -2) * (C ** -0.5)
        s = jnp.where(mask, s, -jnp.inf)
        p = jax.nn.softmax(s, axis=-1)
        heads.append(p @ v[..., sl])
    att = jnp.concatenate(heads, axis=-1)
    x1 = x + (att @ wp + bp[0])
    xn2 = ln(x1, g2, be2)
    ff = jnp.maximum(xn2 @ w1 + bb1[0], 0.0) @ w2 + bb2[0]
    return x1 + ff


def init_params(key, emb_dim):
    C = emb_dim
    ks = jax.random.split(key, 8)
    s = 0.1
    g1 = jnp.ones((1, C), jnp.float32)
    be1 = jnp.zeros((1, C), jnp.float32)
    g2 = jnp.ones((1, C), jnp.float32)
    be2 = jnp.zeros((1, C), jnp.float32)
    wq = s * jax.random.normal(ks[0], (C, C), jnp.float32)
    wk = s * jax.random.normal(ks[1], (C, C), jnp.float32)
    wv = s * jax.random.normal(ks[2], (C, C), jnp.float32)
    wp = s * jax.random.normal(ks[3], (C, C), jnp.float32)
    bp = s * jax.random.normal(ks[4], (1, C), jnp.float32)
    w1 = s * jax.random.normal(ks[5], (C, 4 * C), jnp.float32)
    bb1 = jnp.zeros((1, 4 * C), jnp.float32)
    w2 = s * jax.random.normal(ks[6], (4 * C, C), jnp.float32)
    bb2 = jnp.zeros((1, C), jnp.float32)
    return (g1, be1, wq, wk, wv, wp, bp, g2, be2, w1, bb1, w2, bb2)


if __name__ == "__main__":
    # Block(n_heads=4, emb_dim=32, n_blocks=8, dropout=0.0) in eval mode.
    B, T, C, n_heads = 2, 8, 32, 4
    key = jax.random.PRNGKey(0)
    kx, kp = jax.random.split(key)
    x = jax.random.normal(kx, (B, T, C), jnp.float32)
    params = init_params(kp, C)

    ref = reference_block(x, params, n_heads=n_heads)

    out = jax.block_until_ready(gpt_block(x, params, n_heads=n_heads))
    assert out.shape == (B, T, C)
    # Tolerance covers bf16 MXU operands (f32 reference) + the EUP approximate-reciprocal
    # softmax normalization.
    assert jnp.allclose(out, ref, atol=3e-2, rtol=3e-2), "mismatch vs f32 reference"

    print("KERNEL_OK")
</pallas_src>

<mosaic_0001>
module attributes {stable_mosaic.version = 11 : i64} {
  func.func @_block_kernel(%arg0: i32, %arg1: memref<16x32xf32, #tpu.memory_space<vmem>>, %arg2: memref<1x32xf32, #tpu.memory_space<vmem>>, %arg3: memref<1x32xf32, #tpu.memory_space<vmem>>, %arg4: memref<4x32x8xbf16, #tpu.memory_space<vmem>>, %arg5: memref<4x32x8xbf16, #tpu.memory_space<vmem>>, %arg6: memref<4x32x8xbf16, #tpu.memory_space<vmem>>, %arg7: memref<4x8x32xbf16, #tpu.memory_space<vmem>>, %arg8: memref<1x32xf32, #tpu.memory_space<vmem>>, %arg9: memref<1x32xf32, #tpu.memory_space<vmem>>, %arg10: memref<1x32xf32, #tpu.memory_space<vmem>>, %arg11: memref<32x128xbf16, #tpu.memory_space<vmem>>, %arg12: memref<1x128xf32, #tpu.memory_space<vmem>>, %arg13: memref<128x32xbf16, #tpu.memory_space<vmem>>, %arg14: memref<1x32xf32, #tpu.memory_space<vmem>>, %arg15: memref<16x32xf32, #tpu.memory_space<vmem>>) attributes {dimension_semantics = [#tpu.dimension_semantics<parallel>], iteration_bounds = array<i64: 1>, scalar_prefetch = 0 : i64, scratch_operands = 0 : i64, tpu.core_type = #tpu.core_type<tc>, window_params = [{transform_indices = @transform_0, window_bounds = array<i64: 16, 32>}, {pipeline_mode = #tpu.pipeline_mode<synchronous>, transform_indices = @transform_1, window_bounds = array<i64: 1, 32>}, {pipeline_mode = #tpu.pipeline_mode<synchronous>, transform_indices = @transform_2, window_bounds = array<i64: 1, 32>}, {pipeline_mode = #tpu.pipeline_mode<synchronous>, transform_indices = @transform_3, window_bounds = array<i64: 4, 32, 8>}, {pipeline_mode = #tpu.pipeline_mode<synchronous>, transform_indices = @transform_4, window_bounds = array<i64: 4, 32, 8>}, {pipeline_mode = #tpu.pipeline_mode<synchronous>, transform_indices = @transform_5, window_bounds = array<i64: 4, 32, 8>}, {pipeline_mode = #tpu.pipeline_mode<synchronous>, transform_indices = @transform_6, window_bounds = array<i64: 4, 8, 32>}, {pipeline_mode = #tpu.pipeline_mode<synchronous>, transform_indices = @transform_7, window_bounds = array<i64: 1, 32>}, {pipeline_mode = #tpu.pipeline_mode<synchronous>, transform_indices = @transform_8, window_bounds = array<i64: 1, 32>}, {pipeline_mode = #tpu.pipeline_mode<synchronous>, transform_indices = @transform_9, window_bounds = array<i64: 1, 32>}, {pipeline_mode = #tpu.pipeline_mode<synchronous>, transform_indices = @transform_10, window_bounds = array<i64: 32, 128>}, {pipeline_mode = #tpu.pipeline_mode<synchronous>, transform_indices = @transform_11, window_bounds = array<i64: 1, 128>}, {pipeline_mode = #tpu.pipeline_mode<synchronous>, transform_indices = @transform_12, window_bounds = array<i64: 128, 32>}, {pipeline_mode = #tpu.pipeline_mode<synchronous>, transform_indices = @transform_13, window_bounds = array<i64: 1, 32>}, {transform_indices = @transform_14, window_bounds = array<i64: 16, 32>}]} {
    %c0 = arith.constant 0 : index
    %c0_0 = arith.constant 0 : index
    %0 = vector.load %arg1[%c0, %c0_0] : memref<16x32xf32, #tpu.memory_space<vmem>>, vector<16x32xf32>
    %c0_1 = arith.constant 0 : index
    %c0_2 = arith.constant 0 : index
    %1 = vector.load %arg2[%c0_1, %c0_2] : memref<1x32xf32, #tpu.memory_space<vmem>>, vector<1x32xf32>
    %2 = vector.shape_cast %1 : vector<1x32xf32> to vector<32xf32>
    %c0_3 = arith.constant 0 : index
    %c0_4 = arith.constant 0 : index
    %3 = vector.load %arg3[%c0_3, %c0_4] : memref<1x32xf32, #tpu.memory_space<vmem>>, vector<1x32xf32>
    %4 = vector.shape_cast %3 : vector<1x32xf32> to vector<32xf32>
    %cst = arith.constant dense<0.000000e+00> : vector<16xf32>
    %5 = vector.multi_reduction <add>, %0, %cst [1] : vector<16x32xf32> to vector<16xf32>
    %6 = vector.shape_cast %5 : vector<16xf32> to vector<16x1xf32>
    %cst_5 = arith.constant 3.200000e+01 : f32
    %7 = vector.broadcast %cst_5 : f32 to vector<16x1xf32>
    %8 = arith.divf %6, %7 : vector<16x1xf32>
    %9 = vector.broadcast %8 : vector<16x1xf32> to vector<16x32xf32>
    %10 = arith.subf %0, %9 : vector<16x32xf32>
    %11 = arith.mulf %10, %10 : vector<16x32xf32>
    %cst_6 = arith.constant dense<0.000000e+00> : vector<16xf32>
    %12 = vector.multi_reduction <add>, %11, %cst_6 [1] : vector<16x32xf32> to vector<16xf32>
    %13 = vector.shape_cast %12 : vector<16xf32> to vector<16x1xf32>
    %cst_7 = arith.constant 3.200000e+01 : f32
    %14 = vector.broadcast %cst_7 : f32 to vector<16x1xf32>
    %15 = arith.divf %13, %14 : vector<16x1xf32>
    %16 = vector.broadcast %8 : vector<16x1xf32> to vector<16x32xf32>
    %17 = arith.subf %0, %16 : vector<16x32xf32>
    %cst_8 = arith.constant 9.99999974E-6 : f32
    %18 = vector.broadcast %cst_8 : f32 to vector<16x1xf32>
    %19 = arith.addf %15, %18 : vector<16x1xf32>
    %20 = math.rsqrt %19 : vector<16x1xf32>
    %21 = vector.broadcast %20 : vector<16x1xf32> to vector<16x32xf32>
    %22 = arith.mulf %17, %21 : vector<16x32xf32>
    %23 = vector.shape_cast %2 : vector<32xf32> to vector<1x32xf32>
    %24 = vector.broadcast %23 : vector<1x32xf32> to vector<16x32xf32>
    %25 = arith.mulf %22, %24 : vector<16x32xf32>
    %26 = vector.shape_cast %4 : vector<32xf32> to vector<1x32xf32>
    %27 = vector.broadcast %26 : vector<1x32xf32> to vector<16x32xf32>
    %28 = arith.addf %25, %27 : vector<16x32xf32>
    %29 = arith.truncf %28 : vector<16x32xf32> to vector<16x32xbf16>
    %30 = vector.shape_cast %29 : vector<16x32xbf16> to vector<1x16x32xbf16>
    %31 = vector.broadcast %30 : vector<1x16x32xbf16> to vector<4x16x32xbf16>
    %c0_9 = arith.constant 0 : index
    %c0_10 = arith.constant 0 : index
    %c0_11 = arith.constant 0 : index
    %32 = vector.load %arg4[%c0_9, %c0_10, %c0_11] : memref<4x32x8xbf16, #tpu.memory_space<vmem>>, vector<4x32x8xbf16>
    %cst_12 = arith.constant dense<0.000000e+00> : vector<4x16x8xf32>
    %33 = tpu.matmul %31, %32, %cst_12 {dimension_numbers = #tpu.dot_dimension_numbers<[2], [1], [1], [2], [0, 0, 0, 1, 1, 2], [0], [0]>} : vector<4x16x32xbf16>, vector<4x32x8xbf16>, vector<4x16x8xf32> -> vector<4x16x8xf32>
    %c0_13 = arith.constant 0 : index
    %c0_14 = arith.constant 0 : index
    %c0_15 = arith.constant 0 : index
    %34 = vector.load %arg5[%c0_13, %c0_14, %c0_15] : memref<4x32x8xbf16, #tpu.memory_space<vmem>>, vector<4x32x8xbf16>
    %cst_16 = arith.constant dense<0.000000e+00> : vector<4x16x8xf32>
    %35 = tpu.matmul %31, %34, %cst_16 {dimension_numbers = #tpu.dot_dimension_numbers<[2], [1], [1], [2], [0, 0, 0, 1, 1, 2], [0], [0]>} : vector<4x16x32xbf16>, vector<4x32x8xbf16>, vector<4x16x8xf32> -> vector<4x16x8xf32>
    %c0_17 = arith.constant 0 : index
    %c0_18 = arith.constant 0 : index
    %c0_19 = arith.constant 0 : index
    %36 = vector.load %arg6[%c0_17, %c0_18, %c0_19] : memref<4x32x8xbf16, #tpu.memory_space<vmem>>, vector<4x32x8xbf16>
    %cst_20 = arith.constant dense<0.000000e+00> : vector<4x16x8xf32>
    %37 = tpu.matmul %31, %36, %cst_20 {dimension_numbers = #tpu.dot_dimension_numbers<[2], [1], [1], [2], [0, 0, 0, 1, 1, 2], [0], [0]>} : vector<4x16x32xbf16>, vector<4x32x8xbf16>, vector<4x16x8xf32> -> vector<4x16x8xf32>
    %38 = arith.truncf %33 : vector<4x16x8xf32> to vector<4x16x8xbf16>
    %39 = arith.truncf %35 : vector<4x16x8xf32> to vector<4x16x8xbf16>
    %cst_21 = arith.constant dense<0.000000e+00> : vector<4x16x16xf32>
    %40 = tpu.matmul %38, %39, %cst_21 {dimension_numbers = #tpu.dot_dimension_numbers<[2], [2], [1], [1], [0, 0, 0, 1, 1, 1], [0], [0]>} : vector<4x16x8xbf16>, vector<4x16x8xbf16>, vector<4x16x16xf32> -> vector<4x16x16xf32>
    %41 = tpu.iota {dimensions = array<i32: 0>} : vector<16x16xi32>
    %42 = tpu.iota {dimensions = array<i32: 1>} : vector<16x16xi32>
    %43 = arith.sitofp %41 : vector<16x16xi32> to vector<16x16xf32>
    %cst_22 = arith.constant 5.000000e-01 : f32
    %44 = vector.broadcast %cst_22 : f32 to vector<16x16xf32>
    %45 = arith.addf %43, %44 : vector<16x16xf32>
    %cst_23 = arith.constant 1.250000e-01 : f32
    %46 = vector.broadcast %cst_23 : f32 to vector<16x16xf32>
    %47 = arith.mulf %45, %46 : vector<16x16xf32>
    %48 = math.floor %47 : vector<16x16xf32>
    %49 = arith.sitofp %42 : vector<16x16xi32> to vector<16x16xf32>
    %cst_24 = arith.constant 5.000000e-01 : f32
    %50 = vector.broadcast %cst_24 : f32 to vector<16x16xf32>
    %51 = arith.addf %49, %50 : vector<16x16xf32>
    %cst_25 = arith.constant 1.250000e-01 : f32
    %52 = vector.broadcast %cst_25 : f32 to vector<16x16xf32>
    %53 = arith.mulf %51, %52 : vector<16x16xf32>
    %54 = math.floor %53 : vector<16x16xf32>
    %55 = arith.cmpi sle, %42, %41 : vector<16x16xi32>
    %56 = arith.cmpf oeq, %48, %54 : vector<16x16xf32>
    %57 = arith.andi %55, %56 : vector<16x16xi1>
    %58 = vector.shape_cast %57 : vector<16x16xi1> to vector<1x16x16xi1>
    %cst_26 = arith.constant -1.000000e+30 : f32
    %59 = vector.shape_cast %58 : vector<1x16x16xi1> to vector<1x16x16xi1>
    %60 = vector.broadcast %59 : vector<1x16x16xi1> to vector<4x16x16xi1>
    %61 = vector.broadcast %cst_26 : f32 to vector<4x16x16xf32>
    %62 = arith.select %60, %40, %61 : vector<4x16x16xi1>, vector<4x16x16xf32>
    %cst_27 = arith.constant dense<0xFF800000> : vector<4x16xf32>
    %63 = vector.multi_reduction <maximumf>, %62, %cst_27 [2] : vector<4x16x16xf32> to vector<4x16xf32>
    %64 = vector.shape_cast %63 : vector<4x16xf32> to vector<4x16x1xf32>
    %65 = vector.broadcast %64 : vector<4x16x1xf32> to vector<4x16x16xf32>
    %66 = arith.subf %62, %65 : vector<4x16x16xf32>
    %67 = math.exp %66 : vector<4x16x16xf32>
    %cst_28 = arith.constant dense<0.000000e+00> : vector<4x16xf32>
    %68 = vector.multi_reduction <add>, %67, %cst_28 [2] : vector<4x16x16xf32> to vector<4x16xf32>
    %69 = vector.shape_cast %68 : vector<4x16xf32> to vector<4x16x1xf32>
    %70 = tpu.reciprocal %69 {approx = true} : vector<4x16x1xf32> -> vector<4x16x1xf32>
    %71 = vector.broadcast %70 : vector<4x16x1xf32> to vector<4x16x16xf32>
    %72 = arith.mulf %67, %71 : vector<4x16x16xf32>
    %73 = arith.truncf %72 : vector<4x16x16xf32> to vector<4x16x16xbf16>
    %74 = arith.truncf %37 : vector<4x16x8xf32> to vector<4x16x8xbf16>
    %cst_29 = arith.constant dense<0.000000e+00> : vector<4x16x8xf32>
    %75 = tpu.matmul %73, %74, %cst_29 {dimension_numbers = #tpu.dot_dimension_numbers<[2], [1], [1], [2], [0, 0, 0, 1, 1, 2], [0], [0]>} : vector<4x16x16xbf16>, vector<4x16x8xbf16>, vector<4x16x8xf32> -> vector<4x16x8xf32>
    %c0_30 = arith.constant 0 : index
    %c0_31 = arith.constant 0 : index
    %c0_32 = arith.constant 0 : index
    %76 = vector.load %arg7[%c0_30, %c0_31, %c0_32] : memref<4x8x32xbf16, #tpu.memory_space<vmem>>, vector<4x8x32xbf16>
    %77 = arith.truncf %75 : vector<4x16x8xf32> to vector<4x16x8xbf16>
    %cst_33 = arith.constant dense<0.000000e+00> : vector<4x16x32xf32>
    %78 = tpu.matmul %77, %76, %cst_33 {dimension_numbers = #tpu.dot_dimension_numbers<[2], [1], [1], [2], [0, 0, 0, 1, 1, 2], [0], [0]>} : vector<4x16x8xbf16>, vector<4x8x32xbf16>, vector<4x16x32xf32> -> vector<4x16x32xf32>
    %cst_34 = arith.constant dense<0.000000e+00> : vector<16x32xf32>
    %79 = vector.multi_reduction <add>, %78, %cst_34 [0] : vector<4x16x32xf32> to vector<16x32xf32>
    %80 = arith.addf %0, %79 : vector<16x32xf32>
    %c0_35 = arith.constant 0 : index
    %c0_36 = arith.constant 0 : index
    %81 = vector.load %arg8[%c0_35, %c0_36] : memref<1x32xf32, #tpu.memory_space<vmem>>, vector<1x32xf32>
    %82 = vector.shape_cast %81 : vector<1x32xf32> to vector<32xf32>
    %83 = vector.shape_cast %82 : vector<32xf32> to vector<1x32xf32>
    %84 = vector.broadcast %83 : vector<1x32xf32> to vector<16x32xf32>
    %85 = arith.addf %80, %84 : vector<16x32xf32>
    %c0_37 = arith.constant 0 : index
    %c0_38 = arith.constant 0 : index
    %86 = vector.load %arg9[%c0_37, %c0_38] : memref<1x32xf32, #tpu.memory_space<vmem>>, vector<1x32xf32>
    %87 = vector.shape_cast %86 : vector<1x32xf32> to vector<32xf32>
    %c0_39 = arith.constant 0 : index
    %c0_40 = arith.constant 0 : index
    %88 = vector.load %arg10[%c0_39, %c0_40] : memref<1x32xf32, #tpu.memory_space<vmem>>, vector<1x32xf32>
    %89 = vector.shape_cast %88 : vector<1x32xf32> to vector<32xf32>
    %cst_41 = arith.constant dense<0.000000e+00> : vector<16xf32>
    %90 = vector.multi_reduction <add>, %85, %cst_41 [1] : vector<16x32xf32> to vector<16xf32>
    %91 = vector.shape_cast %90 : vector<16xf32> to vector<16x1xf32>
    %cst_42 = arith.constant 3.200000e+01 : f32
    %92 = vector.broadcast %cst_42 : f32 to vector<16x1xf32>
    %93 = arith.divf %91, %92 : vector<16x1xf32>
    %94 = vector.broadcast %93 : vector<16x1xf32> to vector<16x32xf32>
    %95 = arith.subf %85, %94 : vector<16x32xf32>
    %96 = arith.mulf %95, %95 : vector<16x32xf32>
    %cst_43 = arith.constant dense<0.000000e+00> : vector<16xf32>
    %97 = vector.multi_reduction <add>, %96, %cst_43 [1] : vector<16x32xf32> to vector<16xf32>
    %98 = vector.shape_cast %97 : vector<16xf32> to vector<16x1xf32>
    %cst_44 = arith.constant 3.200000e+01 : f32
    %99 = vector.broadcast %cst_44 : f32 to vector<16x1xf32>
    %100 = arith.divf %98, %99 : vector<16x1xf32>
    %101 = vector.broadcast %93 : vector<16x1xf32> to vector<16x32xf32>
    %102 = arith.subf %85, %101 : vector<16x32xf32>
    %cst_45 = arith.constant 9.99999974E-6 : f32
    %103 = vector.broadcast %cst_45 : f32 to vector<16x1xf32>
    %104 = arith.addf %100, %103 : vector<16x1xf32>
    %105 = math.rsqrt %104 : vector<16x1xf32>
    %106 = vector.broadcast %105 : vector<16x1xf32> to vector<16x32xf32>
    %107 = arith.mulf %102, %106 : vector<16x32xf32>
    %108 = vector.shape_cast %87 : vector<32xf32> to vector<1x32xf32>
    %109 = vector.broadcast %108 : vector<1x32xf32> to vector<16x32xf32>
    %110 = arith.mulf %107, %109 : vector<16x32xf32>
    %111 = vector.shape_cast %89 : vector<32xf32> to vector<1x32xf32>
    %112 = vector.broadcast %111 : vector<1x32xf32> to vector<16x32xf32>
    %113 = arith.addf %110, %112 : vector<16x32xf32>
    %c0_46 = arith.constant 0 : index
    %c0_47 = arith.constant 0 : index
    %114 = vector.load %arg11[%c0_46, %c0_47] : memref<32x128xbf16, #tpu.memory_space<vmem>>, vector<32x128xbf16>
    %115 = arith.truncf %113 : vector<16x32xf32> to vector<16x32xbf16>
    %cst_48 = arith.constant dense<0.000000e+00> : vector<16x128xf32>
    %116 = tpu.matmul %115, %114, %cst_48 {dimension_numbers = #tpu.dot_dimension_numbers<[1], [0], [0], [1], [0, 0, 1, 1], [], []>} : vector<16x32xbf16>, vector<32x128xbf16>, vector<16x128xf32> -> vector<16x128xf32>
    %c0_49 = arith.constant 0 : index
    %c0_50 = arith.constant 0 : index
    %117 = vector.load %arg12[%c0_49, %c0_50] : memref<1x128xf32, #tpu.memory_space<vmem>>, vector<1x128xf32>
    %118 = vector.shape_cast %117 : vector<1x128xf32> to vector<128xf32>
    %119 = vector.shape_cast %118 : vector<128xf32> to vector<1x128xf32>
    %120 = vector.broadcast %119 : vector<1x128xf32> to vector<16x128xf32>
    %121 = arith.addf %116, %120 : vector<16x128xf32>
    %cst_51 = arith.constant 0.000000e+00 : f32
    %122 = vector.broadcast %cst_51 : f32 to vector<16x128xf32>
    %123 = arith.maximumf %121, %122 : vector<16x128xf32>
    %c0_52 = arith.constant 0 : index
    %c0_53 = arith.constant 0 : index
    %124 = vector.load %arg13[%c0_52, %c0_53] : memref<128x32xbf16, #tpu.memory_space<vmem>>, vector<128x32xbf16>
    %125 = arith.truncf %123 : vector<16x128xf32> to vector<16x128xbf16>
    %cst_54 = arith.constant dense<0.000000e+00> : vector<16x32xf32>
    %126 = tpu.matmul %125, %124, %cst_54 {dimension_numbers = #tpu.dot_dimension_numbers<[1], [0], [0], [1], [0, 0, 1, 1], [], []>} : vector<16x128xbf16>, vector<128x32xbf16>, vector<16x32xf32> -> vector<16x32xf32>
    %127 = arith.addf %85, %126 : vector<16x32xf32>
    %c0_55 = arith.constant 0 : index
    %c0_56 = arith.constant 0 : index
    %128 = vector.load %arg14[%c0_55, %c0_56] : memref<1x32xf32, #tpu.memory_space<vmem>>, vector<1x32xf32>
    %129 = vector.shape_cast %128 : vector<1x32xf32> to vector<32xf32>
    %130 = vector.shape_cast %129 : vector<32xf32> to vector<1x32xf32>
    %131 = vector.broadcast %130 : vector<1x32xf32> to vector<16x32xf32>
    %132 = arith.addf %127, %131 : vector<16x32xf32>
    %c0_57 = arith.constant 0 : index
    %c0_58 = arith.constant 0 : index
    %133 = vector.load %arg15[%c0_57, %c0_58] : memref<16x32xf32, #tpu.memory_space<vmem>>, vector<16x32xf32>
    tpu.vector_store %arg15[%c0_57, %c0_58], %132 {strides = array<i32>} : memref<16x32xf32, #tpu.memory_space<vmem>>, vector<16x32xf32>,
    return
  }
  func.func @transform_0(%arg0: i32) -> (i32, i32) {
    %c0_i32 = arith.constant 0 : i32
    %c0_i32_0 = arith.constant 0 : i32
    return %arg0, %c0_i32 : i32, i32
  }
  func.func @transform_1(%arg0: i32) -> (i32, i32) {
    %c0_i32 = arith.constant 0 : i32
    %c0_i32_0 = arith.constant 0 : i32
    %c0_i32_1 = arith.constant 0 : i32
    return %c0_i32, %c0_i32_0 : i32, i32
  }
  func.func @transform_2(%arg0: i32) -> (i32, i32) {
    %c0_i32 = arith.constant 0 : i32
    %c0_i32_0 = arith.constant 0 : i32
    %c0_i32_1 = arith.constant 0 : i32
    return %c0_i32, %c0_i32_0 : i32, i32
  }
  func.func @transform_3(%arg0: i32) -> (i32, i32, i32) {
    %c0_i32 = arith.constant 0 : i32
    %c0_i32_0 = arith.constant 0 : i32
    %c0_i32_1 = arith.constant 0 : i32
    %c0_i32_2 = arith.constant 0 : i32
    return %c0_i32, %c0_i32_0, %c0_i32_1 : i32, i32, i32
  }
  func.func @transform_4(%arg0: i32) -> (i32, i32, i32) {
    %c0_i32 = arith.constant 0 : i32
    %c0_i32_0 = arith.constant 0 : i32
    %c0_i32_1 = arith.constant 0 : i32
    %c0_i32_2 = arith.constant 0 : i32
    return %c0_i32, %c0_i32_0, %c0_i32_1 : i32, i32, i32
  }
  func.func @transform_5(%arg0: i32) -> (i32, i32, i32) {
    %c0_i32 = arith.constant 0 : i32
    %c0_i32_0 = arith.constant 0 : i32
    %c0_i32_1 = arith.constant 0 : i32
    %c0_i32_2 = arith.constant 0 : i32
    return %c0_i32, %c0_i32_0, %c0_i32_1 : i32, i32, i32
  }
  func.func @transform_6(%arg0: i32) -> (i32, i32, i32) {
    %c0_i32 = arith.constant 0 : i32
    %c0_i32_0 = arith.constant 0 : i32
    %c0_i32_1 = arith.constant 0 : i32
    %c0_i32_2 = arith.constant 0 : i32
    return %c0_i32, %c0_i32_0, %c0_i32_1 : i32, i32, i32
  }
  func.func @transform_7(%arg0: i32) -> (i32, i32) {
    %c0_i32 = arith.constant 0 : i32
    %c0_i32_0 = arith.constant 0 : i32
    %c0_i32_1 = arith.constant 0 : i32
    return %c0_i32, %c0_i32_0 : i32, i32
  }
  func.func @transform_8(%arg0: i32) -> (i32, i32) {
    %c0_i32 = arith.constant 0 : i32
    %c0_i32_0 = arith.constant 0 : i32
    %c0_i32_1 = arith.constant 0 : i32
    return %c0_i32, %c0_i32_0 : i32, i32
  }
  func.func @transform_9(%arg0: i32) -> (i32, i32) {
    %c0_i32 = arith.constant 0 : i32
    %c0_i32_0 = arith.constant 0 : i32
    %c0_i32_1 = arith.constant 0 : i32
    return %c0_i32, %c0_i32_0 : i32, i32
  }
  func.func @transform_10(%arg0: i32) -> (i32, i32) {
    %c0_i32 = arith.constant 0 : i32
    %c0_i32_0 = arith.constant 0 : i32
    %c0_i32_1 = arith.constant 0 : i32
    return %c0_i32, %c0_i32_0 : i32, i32
  }
  func.func @transform_11(%arg0: i32) -> (i32, i32) {
    %c0_i32 = arith.constant 0 : i32
    %c0_i32_0 = arith.constant 0 : i32
    %c0_i32_1 = arith.constant 0 : i32
    return %c0_i32, %c0_i32_0 : i32, i32
  }
  func.func @transform_12(%arg0: i32) -> (i32, i32) {
    %c0_i32 = arith.constant 0 : i32
    %c0_i32_0 = arith.constant 0 : i32
    %c0_i32_1 = arith.constant 0 : i32
    return %c0_i32, %c0_i32_0 : i32, i32
  }
  func.func @transform_13(%arg0: i32) -> (i32, i32) {
    %c0_i32 = arith.constant 0 : i32
    %c0_i32_0 = arith.constant 0 : i32
    %c0_i32_1 = arith.constant 0 : i32
    return %c0_i32, %c0_i32_0 : i32, i32
  }
  func.func @transform_14(%arg0: i32) -> (i32, i32) {
    %c0_i32 = arith.constant 0 : i32
    %c0_i32_0 = arith.constant 0 : i32
    return %arg0, %c0_i32 : i32, i32
  }
}

</mosaic_0001>

<bundles_post_ra>
// kernel: tpu_custom_call.1
= control target key start
LH: loop header
LB: loop body
LE: loop exit
PB: predicated region body
PF: predicated region fallthrough
CT: control target
= control target key end

     0   :  { %vm53_vm0 = vcmask 261120   ;;  %s1848_s0 = inlined_call_operand.vmem [shape: f32[16,32], index: 0, kind: input, shape index: {}]   ;;  %s1849_s1 = inlined_call_operand.vmem [shape: f32[1,32], index: 1, kind: input, shape index: {}]   ;;  %s1850_s2 = inlined_call_operand.vmem [shape: f32[1,32], index: 2, kind: input, shape index: {}]   ;;  %s1851_s3 = inlined_call_operand.vmem [shape: bf16[4,32,8], index: 3, kind: input, shape index: {}]   ;;  %s1852_s4 = inlined_call_operand.vmem [shape: bf16[4,32,8], index: 4, kind: input, shape index: {}]   ;;  %s1853_s5 = inlined_call_operand.vmem [shape: bf16[4,32,8], index: 5, kind: input, shape index: {}]   ;;  %s1854_s6 = inlined_call_operand.vmem [shape: bf16[4,8,32], index: 6, kind: input, shape index: {}]   ;;  %s1855_s7 = inlined_call_operand.vmem [shape: f32[1,32], index: 7, kind: input, shape index: {}]   ;;  %s1856_s8 = inlined_call_operand.vmem [shape: f32[1,32], index: 8, kind: input, shape index: {}]   ;;  %s1857_s9 = inlined_call_operand.vmem [shape: f32[1,32], index: 9, kind: input, shape index: {}]   ;;  %s1858_s10 = inlined_call_operand.vmem [shape: bf16[32,128], index: 10, kind: input, shape index: {}]   ;;  %s1859_s11 = inlined_call_operand.vmem [shape: f32[1,128], index: 11, kind: input, shape index: {}]   ;;  %s1860_s12 = inlined_call_operand.vmem [shape: bf16[128,32], index: 12, kind: input, shape index: {}]   ;;  %s1861_s13 = inlined_call_operand.vmem [shape: f32[1,32], index: 13, kind: input, shape index: {}]   ;;  %s1862_s14 = inlined_call_operand.hbm [shape: f32[16,32], index: 14, kind: output, shape index: {}]  }
   0x1   :  { %v1568_v0 = vld [vmem:[%s1848_s0] sm:$0xff] }
   0x2   :  { %v54_v1 = vsel %vm53_vm0, %v1568_v0, 0.0 }
   0x3   :  { %55 = vadd.xlane.f32.xlu0 %v54_v1 }
   0x4   :  { %19 = vsyncpa [#allocation3], 0  ;;  %v1575_v2 = vld [vmem:[%s1848_s0 + $0x8] sm:$0xff]  ;;  %v1486_v4 = vmov 32.0   ;;  %v1376_v24 = vld [vmem:[%s1851_s3 + $0x18] sm:$0xff]  ;;  %vm511_vm8 = vcmask 64512  }
   0x5   :  { %v57_v3 = vsel %vm53_vm0, %v1575_v2, 0.0  ;;  %1418 = vrcp.f32 %v1486_v4  ;;  %v1374_v23 = vld [vmem:[%s1851_s3 + $0x8] sm:$0xff]  ;;  %v1380_v25 = vld [vmem:[%s1851_s3 + $0x38] sm:$0xff]  ;;  %185 = vmatpush.bf16.msra.mxu2 %v1376_v24  ;;  %v1373_v28 = vld [vmem:[%s1851_s3] sm:$0xff]  ;;  %vm657_vm12 = vcmask 130048   ;;  %s1200_s20 = sshll.u32 %s1862_s14, 4  ;;  %s1201_s20 = int_to_ptr.hbm [resolvable:$true] %s1200_s20 }
   0x6   :  { %v1384_v27 = vld [vmem:[%s1852_s4 + $0x18] sm:$0xff]  ;;  %159 = vmatpush.bf16.msra.mxu0 %v1374_v23  ;;  %237 = vmatpush.bf16.msra.mxu3 %v1380_v25  ;;  %v1375_v29 = vld [vmem:[%s1851_s3 + $0x10] sm:$0xff]  ;;  %v1378_v37 = vld [vmem:[%s1851_s3 + $0x28] sm:$0xff]  ;;  %s1489_s21 = smov 8  }
   0x7   :  { %305 = vmatpush.bf16.msra.mxu1 %v1384_v27  ;;  %v1379_v30 = vld [vmem:[%s1851_s3 + $0x30] sm:$0xff]  ;;  %v1382_v38 = vld [vmem:[%s1852_s4 + $0x8] sm:$0xff]  ;;  %v1388_v39 = vld [vmem:[%s1852_s4 + $0x38] sm:$0xff] }
   0x8   :  { %v1383_v31 = vld [vmem:[%s1852_s4 + $0x10] sm:$0xff]  ;;  %v1392_v40 = vld [vmem:[%s1853_s5 + $0x18] sm:$0xff]  ;;  %v1377_v42 = vld [vmem:[%s1851_s3 + $0x20] sm:$0xff] }
   0x9   :  { %186 = vmatpush.bf16.msra.mxu2 %v1375_v29  ;;  %v1381_v43 = vld [vmem:[%s1852_s4] sm:$0xff]  ;;  %v1387_v44 = vld [vmem:[%s1852_s4 + $0x30] sm:$0xff] }
   0xa   :  { %160 = vmatpush.bf16.msra.mxu0 %v1373_v28  ;;  %238 = vmatpush.bf16.msra.mxu3 %v1379_v30  ;;  %v1391_v45 = vld [vmem:[%s1853_s5 + $0x10] sm:$0xff]  ;;  %v1411_v53 = vld [vmem:[%s1849_s1] ss:$0 sm:$0xff] }
   0xb   :  { %58 = vadd.xlane.f32.xlu0 %v57_v3  ;;  %v1419_v5 = vpop.eup %1418  ;;  %306 = vmatpush.bf16.msra.mxu1 %v1383_v31  ;;  %v1412_v57 = vld [vmem:[%s1850_s2] ss:$0 sm:$0xff] }
   0xc   :  { %v61_v6 = vmul.f32 32.0, %v1419_v5  ;;  %vm65_vm1 = vweird.f32 %v1419_v5 }
   0xd   :  { %211 = vmatpush.bf16.msrb.mxu2 %v1378_v37 }
   0xe   :  { %v62_v7 = vsub.f32 1.0, %v61_v6  ;;  %279 = vmatpush.bf16.msrb.mxu0 %v1382_v38  ;;  %357 = vmatpush.bf16.msrb.mxu3 %v1388_v39 }
   0xf   :  { %425 = vmatpush.bf16.msrb.mxu1 %v1392_v40 }
  0x10   :  { %v63_v8 = vmul.f32 %v1419_v5, %v62_v7 }
  0x11   :  { %212 = vmatpush.bf16.msrb.mxu2 %v1377_v42 }
  0x12   :  { %v64_v9 = vadd.f32 %v1419_v5, %v63_v8  ;;  %280 = vmatpush.bf16.msrb.mxu0 %v1381_v43  ;;  %358 = vmatpush.bf16.msrb.mxu3 %v1387_v44  ;;  %v1386_v8 = vld [vmem:[%s1852_s4 + $0x28] sm:$0xff] }
  0x13   :  { %426 = vmatpush.bf16.msrb.mxu1 %v1391_v45 }
  0x14   :  { %v1579_v10 = vsel %vm65_vm1, %v1419_v5, %v64_v9  ;;  %v1390_v9 = vld [vmem:[%s1853_s5 + $0x8] sm:$0xff]  ;;  %vm894_vm1 = vcmask 1043456  }
  0x76   :  { %v56_v11 = vpop.xlane.xlu0 %55 }
  0x77   :  { %v67_v12 = vmul.f32 %v1579_v10, %v56_v11  ;;  %v1396_v11 = vld [vmem:[%s1853_s5 + $0x38] sm:$0xff] }
  0x79   :  { %v1583_v13 = vsub.f32 %v1568_v0, %v67_v12  ;;  %v1385_v12 = vld [vmem:[%s1852_s4 + $0x20] sm:$0xff] }
  0x7b   :  { %v71_v14 = vmul.f32 %v1583_v13, %v1583_v13 }
  0x7d   :  { %v73_v15 = vsel %vm53_vm0, %v71_v14, 0.0  ;;  %v1395_v14 = vld [vmem:[%s1853_s5 + $0x30] sm:$0xff] }
  0x7e   :  { %74 = vadd.xlane.f32.xlu1 %v73_v15  ;;  %v59_v16 = vpop.xlane.xlu0 %58  ;;  %v1394_v15 = vld [vmem:[%s1853_s5 + $0x28] sm:$0xff] }
  0x7f   :  { %v68_v17 = vmul.f32 %v1579_v10, %v59_v16  ;;  %v1393_v16 = vld [vmem:[%s1853_s5 + $0x20] sm:$0xff] }
  0x81   :  { %v1590_v18 = vsub.f32 %v1575_v2, %v68_v17 }
  0x83   :  { %v72_v19 = vmul.f32 %v1590_v18, %v1590_v18 }
  0x85   :  { %v76_v20 = vsel %vm53_vm0, %v72_v19, 0.0 }
  0x86   :  { %77 = vadd.xlane.f32.xlu1 %v76_v20 }
  0xf1   :  { %v75_v21 = vpop.xlane.xlu1 %74 }
  0xf2   :  { %v79_v22 = vmul.f32 %v75_v21, %v1579_v10 }
  0xf4   :  { %v81_v26 = vadd.f32 1e-05, %v79_v22 }
  0xf6   :  { %1420 = vrsqrt.f32 %v81_v26  ;;  %vm89_vm3 = vweird.f32 %v81_v26 }
  0xf9   :  { %v78_v32 = vpop.xlane.xlu1 %77 }
  0xfa   :  { %v80_v33 = vmul.f32 %v78_v32, %v1579_v10 }
  0xfc   :  { %v1421_v34 = vpop.eup %1420  ;;  %v82_v35 = vadd.f32 1e-05, %v80_v33 }
  0xfd   :  { %v84_v36 = vmul.f32 %v1421_v34, %v81_v26  ;;  %vm90_vm2 = vweird.f32 %v1421_v34 }
  0xfe   :  { %1422 = vrsqrt.f32 %v82_v35  ;;  %vm91_vm4 = vmor %vm89_vm3, %vm90_vm2  ;;  %vm99_vm6 = vweird.f32 %v82_v35 }
  0xff   :  { %v85_v41 = vmul.f32 %v1421_v34, %v84_v36 }
 0x101   :  { %v86_v46 = vmul.f32 0.5, %v85_v41 }
 0x103   :  { %v87_v47 = vsub.f32 1.5, %v86_v46 }
 0x104   :  { %v1423_v48 = vpop.eup %1422 }
 0x105   :  { %v88_v49 = vmul.f32 %v1421_v34, %v87_v47  ;;  %v94_v50 = vmul.f32 %v1423_v48, %v82_v35  ;;  %vm100_vm5 = vweird.f32 %v1423_v48 }
 0x106   :  { %vm101_vm7 = vmor %vm99_vm6, %vm100_vm5 }
 0x107   :  { %v92_v51 = vsel %vm91_vm4, %v1421_v34, %v88_v49  ;;  %v95_v52 = vmul.f32 %v1423_v48, %v94_v50 }
 0x108   :  { %v103_v54 = vmul.f32 %v92_v51, %v1583_v13  ;;  %v1389_v13 = vld [vmem:[%s1853_s5] sm:$0xff] }
 0x109   :  { %v96_v55 = vmul.f32 0.5, %v95_v52 }
 0x10a   :  { %v108_v58 = vmul.f32 %v1411_v53, %v103_v54 }
 0x10b   :  { %v97_v56 = vsub.f32 1.5, %v96_v55 }
 0x10c   :  { %v113_v61 = vadd.f32 %v1412_v57, %v108_v58 }
 0x10d   :  { %v98_v59 = vmul.f32 %v1423_v48, %v97_v56 }
 0x10e   :  { %v115_v1 = vpack.c.bf16 %v113_v61, %v113_v61 }
 0x10f   :  { %v102_v60 = vsel %vm101_vm7, %v1423_v48, %v98_v59 }
 0x110   :  { %v104_v62 = vmul.f32 %v102_v60, %v1590_v18  ;;  %v135_v5 = vunpack.c.l.b16 %v115_v1 }
 0x112   :  { %v109_v63 = vmul.f32 %v1411_v53, %v104_v62 }
 0x114   :  { %v114_v3 = vadd.f32 %v1412_v57, %v109_v63 }
 0x116   :  { %v116_v4 = vpack.c.bf16 %v114_v3, %v114_v3 }
 0x118   :  { %v136_v6 = vunpack.c.l.b16 %v116_v4 }
 0x11a   :  { %v137_v7 = vpack.c.b16 %v136_v6, %v135_v5 }
 0x11c   :  { %1220 = vmatmul.msk.bf16.vlgmr.msra.gmra.mxu0 %vm53_vm0, %v137_v7  ;;  %1229 = vmatmul.msk.bf16.vlgmr.msra.gmra.mxu2 %vm53_vm0, %v137_v7 }
 0x11d   :  { %1247 = vmatmul.msk.bf16.vlgmr.msra.gmra.mxu3 %vm53_vm0, %v137_v7  ;;  %1265 = vmatmul.msk.bf16.vlgmr.msra.gmra.mxu1 %vm53_vm0, %v137_v7 }
 0x11e   :  { %331 = vmatpush.bf16.msra.mxu2 %v1386_v8  ;;  %399 = vmatpush.bf16.msra.mxu0 %v1390_v9 }
 0x11f   :  { %477 = vmatpush.bf16.msra.mxu3 %v1396_v11 }
 0x122   :  { %332 = vmatpush.bf16.msra.mxu2 %v1385_v12  ;;  %400 = vmatpush.bf16.msra.mxu0 %v1389_v13 }
 0x123   :  { %478 = vmatpush.bf16.msra.mxu3 %v1395_v14 }
 0x12c   :  { %1238 = vmatmul.msk.bf16.vlgmr.msrb.gmra.mxu2 %vm53_vm0, %v137_v7  ;;  %1256 = vmatmul.msk.bf16.vlgmr.msrb.gmra.mxu0 %vm53_vm0, %v137_v7 }
 0x12d   :  { %1283 = vmatmul.msk.bf16.vlgmr.msrb.gmra.mxu3 %vm53_vm0, %v137_v7  ;;  %1301 = vmatmul.msk.bf16.vlgmr.msrb.gmra.mxu1 %vm53_vm0, %v137_v7 }
 0x12e   :  { %451 = vmatpush.bf16.msrb.mxu2 %v1394_v15 }
 0x132   :  { %452 = vmatpush.bf16.msrb.mxu2 %v1393_v16 }
 0x13c   :  { %1274 = vmatmul.msk.bf16.vlgmr.msra.gmra.mxu2 %vm53_vm0, %v137_v7  ;;  %1292 = vmatmul.msk.bf16.vlgmr.msra.gmra.mxu0 %vm53_vm0, %v137_v7 }
 0x13d   :  { %1319 = vmatmul.msk.bf16.vlgmr.msra.gmra.mxu3 %vm53_vm0, %v137_v7 }
 0x14c   :  { %1310 = vmatmul.msk.bf16.vlgmr.msrb.gmra.mxu2 %vm53_vm0, %v137_v7 }
 0x199   :  { %v162_v17 = vpop.f32.mrf.mxu0 }
 0x19a   :  { %v308_v18 = vpop.f32.mrf.mxu1  ;;  %v485_v55 = vpack.c.bf16 %v162_v17, %v162_v17 }
 0x19b   :  { %v495_v21 = vpack.c.bf16 %v308_v18, %v308_v18 }
 0x19c   :  { %v503_v63 = vunpack.c.l.b16 %v485_v55 }
 0x19d   :  { %v539_v25 = vunpack.c.l.b16 %v495_v21 }
 0x19f   :  { %v188_v19 = vpop.f32.mrf.mxu2 }
 0x1a0   :  { %v240_v20 = vpop.f32.mrf.mxu3  ;;  %v487_v31 = vpack.c.bf16 %v188_v19, %v188_v19 }
 0x1a1   :  { %v164_v22 = vpop.f32.mrf.mxu0  ;;  %v491_v5 = vpack.c.bf16 %v240_v20, %v240_v20 }
 0x1a2   :  { %v310_v23 = vpop.f32.mrf.mxu1  ;;  %v534_v36 = vunpack.c.l.b16 %v487_v31  ;;  %v486_v50 = vpack.c.bf16 %v164_v22, %v164_v22 }
 0x1a3   :  { %v496_v24 = vpack.c.bf16 %v310_v23, %v310_v23  ;;  %v594_v14 = vunpack.c.l.b16 %v491_v5 }
 0x1a4   :  { %v504_v60 = vunpack.c.l.b16 %v486_v50 }
 0x1a5   :  { %v540_v26 = vunpack.c.l.b16 %v496_v24 }
 0x1a6   :  { %v505_v4 = vpack.c.b16 %v504_v60, %v503_v63 }
 0x1a7   :  { %v541_v27 = vpack.c.b16 %v540_v26, %v539_v25  ;;  %v190_v28 = vpop.f32.mrf.mxu2 }
 0x1a8   :  { %v488_v29 = vpack.c.bf16 %v190_v28, %v190_v28  ;;  %v242_v30 = vpop.f32.mrf.mxu3 }
 0x1a9   :  { %v282_v32 = vpop.f32.mrf.mxu0  ;;  %v546_v33 = vsel %vm511_vm8, %v541_v27, 0  ;;  %v492_v1 = vpack.c.bf16 %v242_v30, %v242_v30 }
 0x1aa   :  { %v428_v34 = vpop.f32.mrf.mxu1  ;;  %555 = vmatpush.bf16.xpose.msra.mxu1 %v546_v33  ;;  %v535_v35 = vunpack.c.l.b16 %v488_v29  ;;  %v493_v39 = vpack.c.bf16 %v282_v32, %v282_v32 }
 0x1ab   :  { %v756_v41 = vpack.c.bf16 %v428_v34, %v428_v34  ;;  %v595_v11 = vunpack.c.l.b16 %v492_v1 }
 0x1ac   :  { %v536_v37 = vpack.c.b16 %v535_v35, %v534_v36  ;;  %v508_v46 = vunpack.c.l.b16 %v493_v39 }
 0x1ad   :  { %v797_v48 = vunpack.c.l.b16 %v756_v41  ;;  %v596_v17 = vpack.c.b16 %v595_v11, %v594_v14 }
 0x1af   :  { %v1690_v38 = vpop.f32.mrf.mxu2 }
 0x1b0   :  { %v360_v40 = vpop.f32.mrf.mxu3  ;;  %v489_v32 = vpack.c.bf16 %v1690_v38, %v1690_v38 }
 0x1b1   :  { %1321 = vmatmul.msk.bf16.vlgmr.msra.gmra.mxu1 %vm511_vm8, %v536_v37  ;;  %v284_v42 = vpop.f32.mrf.mxu0  ;;  %v499_v52 = vpack.c.bf16 %v360_v40, %v360_v40 }
 0x1b2   :  { %v494_v43 = vpack.c.bf16 %v284_v42, %v284_v42  ;;  %v430_v44 = vpop.f32.mrf.mxu1  ;;  %v564_v36 = vunpack.c.l.b16 %v489_v32 }
 0x1b3   :  { %v757_v45 = vpack.c.bf16 %v430_v44, %v430_v44  ;;  %v599_v61 = vunpack.c.l.b16 %v499_v52 }
 0x1b4   :  { %v509_v47 = vunpack.c.l.b16 %v494_v43 }
 0x1b5   :  { %v798_v49 = vunpack.c.l.b16 %v757_v45  ;;  %v622_v45 = vlaneseq }
 0x1b6   :  { %v510_v51 = vpack.c.b16 %v509_v47, %v508_v46 }
 0x1b7   :  { %v799_v53 = vpack.c.b16 %v798_v49, %v797_v48  ;;  %v216_v54 = vpop.f32.mrf.mxu2  ;;  %v623_v46 = vshrl.u32 %v622_v45, 7  ;;  %v626_v38 = vand.u32 127, %v622_v45 }
 0x1b8   :  { %v362_v56 = vpop.f32.mrf.mxu3  ;;  %v516_v57 = vsel %vm511_vm8, %v510_v51, 0  ;;  %v490_v29 = vpack.c.bf16 %v216_v54, %v216_v54 }
 0x1b9   :  { %v500_v58 = vpack.c.bf16 %v362_v56, %v362_v56  ;;  %811 = vmatpush.bf16.msrb.mxu1 %v799_v53  ;;  %v402_v59 = vpop.f32.mrf.mxu0  ;;  %525 = vmatpush.bf16.xpose.msrb.mxu0 %v516_v57  ;;  %v627_v47 = vcvt.s32.f32 %v623_v46  ;;  %v635_v48 = vcvt.s32.f32 %v626_v38  ;;  %v624_v49 = vadd.s32 8, %v623_v46 }
 0x1ba   :  { %v754_v8 = vpack.c.bf16 %v402_v59, %v402_v59  ;;  %v565_v35 = vunpack.c.l.b16 %v490_v29  ;;  %vm639_vm9 = vcmp.le.s32.totalorder %v626_v38, %v623_v46 }
 0x1bb   :  { %v600_v62 = vunpack.c.l.b16 %v500_v58  ;;  %v629_v50 = vadd.f32 0.5, %v627_v47  ;;  %v636_v51 = vadd.f32 0.5, %v635_v48  ;;  %v628_v52 = vcvt.s32.f32 %v624_v49 }
 0x1bc   :  { %v769_v15 = vunpack.c.l.b16 %v754_v8  ;;  %v566_v37 = vpack.c.b16 %v565_v35, %v564_v36  ;;  %vm640_vm13 = vcmp.le.s32.totalorder %v626_v38, %v624_v49 }
 0x1bd   :  { %v601_v3 = vpack.c.b16 %v600_v62, %v599_v61  ;;  %v631_v53 = vmul.f32 0.125, %v629_v50  ;;  %v637_v54 = vmul.f32 0.125, %v636_v51  ;;  %v630_v55 = vadd.f32 0.5, %v628_v52 }
 0x1bf   :  { %v334_v6 = vpop.f32.mrf.mxu2  ;;  %v606_v7 = vsel %vm511_vm8, %v601_v3, 0  ;;  %v633_v56 = vfloor.f32 %v631_v53  ;;  %v638_v57 = vfloor.f32 %v637_v54  ;;  %v632_v59 = vmul.f32 0.125, %v630_v55 }
 0x1c0   :  { %v480_v9 = vpop.f32.mrf.mxu3  ;;  %615 = vmatpush.bf16.xpose.msrb.mxu3 %v606_v7  ;;  %1320 = vmatmul.msk.bf16.vlgmr.msrb.gmra.mxu0 %vm511_vm8, %v505_v4  ;;  %v497_v18 = vpack.c.bf16 %v334_v6, %v334_v6 }
 0x1c1   :  { %v404_v12 = vpop.f32.mrf.mxu0  ;;  %v760_v21 = vpack.c.bf16 %v480_v9, %v480_v9  ;;  %vm641_vm10 = vcmp.eq.f32.partialorder %v633_v56, %v638_v57  ;;  %v634_v60 = vfloor.f32 %v632_v59 }
 0x1c2   :  { %v755_v13 = vpack.c.bf16 %v404_v12, %v404_v12  ;;  %v569_v25 = vunpack.c.l.b16 %v497_v18  ;;  %vm1701_vm11 = vmand %vm639_vm9, %vm641_vm10 }
 0x1c3   :  { %v853_v27 = vunpack.c.l.b16 %v760_v21  ;;  %vm642_vm14 = vcmp.eq.f32.partialorder %v634_v60, %v638_v57 }
 0x1c4   :  { %v770_v16 = vunpack.c.l.b16 %v755_v13  ;;  %vm1708_vm15 = vmand %vm640_vm13, %vm642_vm14 }
 0x1c6   :  { %v771_v19 = vpack.c.b16 %v770_v16, %v769_v15 }
 0x1c7   :  { %1323 = vmatmul.msk.bf16.vlgmr.msrb.gmra.mxu3 %vm511_vm8, %v596_v17  ;;  %v336_v20 = vpop.f32.mrf.mxu2 }
 0x1c8   :  { %v498_v22 = vpack.c.bf16 %v336_v20, %v336_v20  ;;  %v482_v23 = vpop.f32.mrf.mxu3  ;;  %783 = vmatpush.bf16.msra.mxu0 %v771_v19 }
 0x1c9   :  { %v761_v24 = vpack.c.bf16 %v482_v23, %v482_v23 }
 0x1ca   :  { %v570_v26 = vunpack.c.l.b16 %v498_v22 }
 0x1cb   :  { %v854_v28 = vunpack.c.l.b16 %v761_v24 }
 0x1cc   :  { %v571_v30 = vpack.c.b16 %v570_v26, %v569_v25 }
 0x1cd   :  { %v855_v31 = vpack.c.b16 %v854_v28, %v853_v27 }
 0x1ce   :  { %v576_v33 = vsel %vm511_vm8, %v571_v30, 0 }
 0x1cf   :  { %867 = vmatpush.bf16.msra.mxu3 %v855_v31  ;;  %v454_v34 = vpop.f32.mrf.mxu2  ;;  %585 = vmatpush.bf16.xpose.msra.mxu2 %v576_v33 }
 0x1d0   :  { %v758_v39 = vpack.c.bf16 %v454_v34, %v454_v34 }
 0x1d2   :  { %v825_v42 = vunpack.c.l.b16 %v758_v39 }
 0x1d6   :  { %1322 = vmatmul.msk.bf16.vlgmr.msra.gmra.mxu2 %vm511_vm8, %v566_v37 }
 0x1d7   :  { %v456_v40 = vpop.f32.mrf.mxu2 }
 0x1d8   :  { %v759_v41 = vpack.c.bf16 %v456_v40, %v456_v40 }
 0x1da   :  { %v826_v43 = vunpack.c.l.b16 %v759_v41 }
 0x1dc   :  { %v827_v44 = vpack.c.b16 %v826_v43, %v825_v42 }
 0x1de   :  { %839 = vmatpush.bf16.msrb.mxu2 %v827_v44 }
 0x22e   :  { %v557_v11 = vpop.f32.mrf.mxu1 }
 0x22f   :  { %v651_v12 = vsel %vm1701_vm11, %v557_v11, -1e+30 }
 0x230   :  { %v664_v16 = vsel %vm657_vm12, %v651_v12, -inf }
 0x236   :  { %v559_v22 = vpop.f32.mrf.mxu1 }
 0x237   :  { %v652_v23 = vsel %vm1708_vm15, %v559_v22, -1e+30 }
 0x238   :  { %v667_v24 = vsel %vm657_vm12, %v652_v23, -inf }
 0x23d   :  { %v527_v58 = vpop.f32.mrf.mxu0 }
 0x23e   :  { %v649_v21 = vsel %vm1701_vm11, %v527_v58, -1e+30 }
 0x23f   :  { %v658_v20 = vsel %vm657_vm12, %v649_v21, -inf }
 0x245   :  { %v529_v3 = vpop.f32.mrf.mxu0 }
 0x246   :  { %v650_v5 = vsel %vm1708_vm15, %v529_v3, -1e+30 }
 0x247   :  { %v661_v9 = vsel %vm657_vm12, %v650_v5, -inf }
 0x24a   :  { %v617_v62 = vpop.f32.mrf.mxu3 }
 0x24b   :  { %v655_v63 = vsel %vm1701_vm11, %v617_v62, -1e+30 }
 0x24c   :  { %v676_v1 = vsel %vm657_vm12, %v655_v63, -inf }
 0x24d   :  { %677 = vmax.xlane.f32.xlu0 %v676_v1 }
 0x252   :  { %v619_v6 = vpop.f32.mrf.mxu3 }
 0x253   :  { %v656_v7 = vsel %vm1708_vm15, %v619_v6, -1e+30 }
 0x254   :  { %v679_v8 = vsel %vm657_vm12, %v656_v7, -inf }
 0x255   :  { %680 = vmax.xlane.f32.xlu1 %v679_v8  ;;  %662 = vmax.xlane.f32.xlu0 %v661_v9 }
 0x259   :  { %v587_v13 = vpop.f32.mrf.mxu2 }
 0x25a   :  { %v653_v14 = vsel %vm1701_vm11, %v587_v13, -1e+30 }
 0x25b   :  { %v670_v15 = vsel %vm657_vm12, %v653_v14, -inf }
 0x25c   :  { %671 = vmax.xlane.f32.xlu2 %v670_v15 }
 0x25d   :  { %665 = vmax.xlane.f32.xlu1 %v664_v16 }
 0x261   :  { %v589_v17 = vpop.f32.mrf.mxu2 }
 0x262   :  { %v654_v18 = vsel %vm1708_vm15, %v589_v17, -1e+30 }
 0x263   :  { %v673_v19 = vsel %vm657_vm12, %v654_v18, -inf }
 0x264   :  { %674 = vmax.xlane.f32.xlu2 %v673_v19 }
 0x26c   :  { %659 = vmax.xlane.f32.xlu2 %v658_v20 }
 0x274   :  { %668 = vmax.xlane.f32.xlu2 %v667_v24 }
 0x2c0   :  { %v678_v25 = vpop.xlane.xlu0 %677 }
 0x2c1   :  { %v688_v26 = vsub.f32 %v655_v63, %v678_v25 }
 0x2c3   :  { %v702_v27 = vmul.f32 1.442695, %v688_v26 }
 0x2c5   :  { %1424 = vpow2.f32 %v702_v27 }
 0x2c8   :  { %v663_v28 = vpop.xlane.xlu0 %662  ;;  %v681_v33 = vpop.xlane.xlu1 %680 }
 0x2c9   :  { %v683_v29 = vsub.f32 %v650_v5, %v663_v28  ;;  %v689_v36 = vsub.f32 %v656_v7, %v681_v33 }
 0x2cb   :  { %v1733_v30 = vpop.eup %1424  ;;  %v692_v31 = vmul.f32 1.442695, %v683_v29  ;;  %v704_v41 = vmul.f32 1.442695, %v689_v36 }
 0x2cc   :  { %v724_v32 = vsel %vm657_vm12, %v1733_v30, 0.0 }
 0x2cd   :  { %725 = vadd.xlane.f32.xlu2 %v724_v32  ;;  %1426 = vpow2.f32 %v692_v31 }
 0x2cf   :  { %v672_v34 = vpop.xlane.xlu2 %671 }
 0x2d0   :  { %v686_v35 = vsub.f32 %v653_v14, %v672_v34  ;;  %v666_v42 = vpop.xlane.xlu1 %665 }
 0x2d1   :  { %v684_v46 = vsub.f32 %v651_v12, %v666_v42 }
 0x2d2   :  { %v698_v37 = vmul.f32 1.442695, %v686_v35 }
 0x2d3   :  { %v1737_v39 = vpop.eup %1426  ;;  %v694_v48 = vmul.f32 1.442695, %v684_v46 }
 0x2d4   :  { %1428 = vpow2.f32 %v698_v37  ;;  %v709_v40 = vsel %vm657_vm12, %v1737_v39, 0.0 }
 0x2d5   :  { %710 = vadd.xlane.f32.xlu2 %v709_v40  ;;  %1430 = vpow2.f32 %v704_v41 }
 0x2d7   :  { %v675_v43 = vpop.xlane.xlu2 %674 }
 0x2d8   :  { %v687_v44 = vsub.f32 %v654_v18, %v675_v43 }
 0x2da   :  { %v1429_v45 = vpop.eup %1428  ;;  %v700_v38 = vmul.f32 1.442695, %v687_v44 }
 0x2db   :  { %v718_v47 = vsel %vm657_vm12, %v1429_v45, 0.0  ;;  %v1431_v50 = vpop.eup %1430 }
 0x2dc   :  { %1432 = vpow2.f32 %v700_v38  ;;  %719 = vadd.xlane.f32.xlu0 %v718_v47  ;;  %v727_v55 = vsel %vm657_vm12, %v1431_v50, 0.0 }
 0x2dd   :  { %1434 = vpow2.f32 %v694_v48  ;;  %v876_v48 = vld [vmem:[%s1854_s6 + $0x8] sm:$0xf] }
 0x2df   :  { %v660_v49 = vpop.xlane.xlu2 %659 }
 0x2e0   :  { %v682_v51 = vsub.f32 %v649_v21, %v660_v49  ;;  %v877_v49 = vld [vmem:[%s1854_s6 + $0xc] sm:$0xf] }
 0x2e2   :  { %v1433_v52 = vpop.eup %1432  ;;  %v690_v53 = vmul.f32 1.442695, %v682_v51  ;;  %v971_v51 = vsel %vm894_vm1, %v877_v49, 0 }
 0x2e3   :  { %v721_v54 = vsel %vm657_vm12, %v1433_v52, 0.0  ;;  %v1435_v57 = vpop.eup %1434  ;;  %980 = vmatpush.bf16.msrb.mxu3 %v971_v51 }
 0x2e4   :  { %1436 = vpow2.f32 %v690_v53  ;;  %722 = vadd.xlane.f32.xlu1 %v721_v54  ;;  %728 = vadd.xlane.f32.xlu0 %v727_v55  ;;  %v712_v62 = vsel %vm657_vm12, %v1435_v57, 0.0  ;;  %v875_v54 = vld [vmem:[%s1854_s6 + $0x4] sm:$0xf] }
 0x2e5   :  { %v921_v55 = vsel %vm894_vm1, %v875_v54, 0 }
 0x2e6   :  { %930 = vmatpush.bf16.msra.mxu1 %v921_v55 }
 0x2e7   :  { %v669_v56 = vpop.xlane.xlu2 %668 }
 0x2e8   :  { %v685_v58 = vsub.f32 %v652_v23, %v669_v56 }
 0x2ea   :  { %v1437_v59 = vpop.eup %1436  ;;  %v696_v60 = vmul.f32 1.442695, %v685_v58 }
 0x2eb   :  { %v706_v61 = vsel %vm657_vm12, %v1437_v59, 0.0 }
 0x2ec   :  { %1438 = vpow2.f32 %v696_v60  ;;  %707 = vadd.xlane.f32.xlu1 %v706_v61  ;;  %713 = vadd.xlane.f32.xlu0 %v712_v62 }
 0x2f2   :  { %v1439_v63 = vpop.eup %1438 }
 0x2f3   :  { %v715_v1 = vsel %vm657_vm12, %v1439_v63, 0.0 }
 0x2f4   :  { %716 = vadd.xlane.f32.xlu1 %v715_v1 }
 0x340   :  { %v726_v3 = vpop.xlane.xlu2 %725 }
 0x348   :  { %v711_v5 = vpop.xlane.xlu2 %710 }
 0x34f   :  { %v720_v4 = vpop.xlane.xlu0 %719 }
 0x350   :  { %1440 = vrcp.f32 %v720_v4 }
 0x351   :  { %1442 = vrcp.f32 %v726_v3 }
 0x356   :  { %v1441_v8 = vpop.eup %1440 }
 0x357   :  { %v723_v6 = vpop.xlane.xlu1 %722  ;;  %v729_v7 = vpop.xlane.xlu0 %728  ;;  %v742_v11 = vmul.f32 %v1441_v8, %v1429_v45 }
 0x358   :  { %1444 = vrcp.f32 %v723_v6  ;;  %v1443_v9 = vpop.eup %1442 }
 0x359   :  { %1446 = vrcp.f32 %v729_v7  ;;  %v744_v12 = vmul.f32 %v1443_v9, %v1733_v30  ;;  %v750_v15 = vpack.c.bf16 %v742_v11, %v742_v11 }
 0x35a   :  { %1448 = vrcp.f32 %v711_v5 }
 0x35b   :  { %v752_v21 = vpack.c.bf16 %v744_v12, %v744_v12  ;;  %v820_v25 = vunpack.c.l.b16 %v750_v15 }
 0x35d   :  { %v848_v27 = vunpack.c.l.b16 %v752_v21 }
 0x35e   :  { %v1445_v13 = vpop.eup %1444 }
 0x35f   :  { %v1447_v14 = vpop.eup %1446  ;;  %v743_v16 = vmul.f32 %v1445_v13, %v1433_v52  ;;  %v708_v17 = vpop.xlane.xlu1 %707  ;;  %v874_v52 = vld [vmem:[%s1854_s6] sm:$0xf] }
 0x360   :  { %v714_v18 = vpop.xlane.xlu0 %713  ;;  %v1449_v19 = vpop.eup %1448  ;;  %v745_v20 = vmul.f32 %v1447_v14, %v1431_v50  ;;  %1450 = vrcp.f32 %v708_v17  ;;  %v946_v50 = vsel %vm894_vm1, %v876_v48, 0  ;;  %v896_v53 = vsel %vm894_vm1, %v874_v52, 0 }
 0x361   :  { %v751_v22 = vpack.c.bf16 %v743_v16, %v743_v16  ;;  %1452 = vrcp.f32 %v714_v18  ;;  %v739_v24 = vmul.f32 %v1449_v19, %v1737_v39  ;;  %955 = vmatpush.bf16.msra.mxu2 %v946_v50  ;;  %905 = vmatpush.bf16.msrb.mxu0 %v896_v53 }
 0x362   :  { %v753_v23 = vpack.c.bf16 %v745_v20, %v745_v20 }
 0x363   :  { %v821_v26 = vunpack.c.l.b16 %v751_v22  ;;  %v747_v32 = vpack.c.bf16 %v739_v24, %v739_v24 }
 0x364   :  { %v849_v28 = vunpack.c.l.b16 %v753_v23 }
 0x365   :  { %v822_v29 = vpack.c.b16 %v821_v26, %v820_v25  ;;  %v765_v37 = vunpack.c.l.b16 %v747_v32 }
 0x366   :  { %v1451_v30 = vpop.eup %1450  ;;  %v850_v31 = vpack.c.b16 %v849_v28, %v848_v27 }
 0x367   :  { %v738_v33 = vmul.f32 %v1451_v30, %v1437_v59  ;;  %v717_v34 = vpop.xlane.xlu1 %716  ;;  %1326 = vmatmul.msk.bf16.vlgmr.msrb.gmra.mxu2 %vm657_vm12, %v822_v29  ;;  %v1453_v35 = vpop.eup %1452 }
 0x368   :  { %1454 = vrcp.f32 %v717_v34  ;;  %1327 = vmatmul.msk.bf16.vlgmr.msra.gmra.mxu3 %vm657_vm12, %v850_v31  ;;  %v740_v39 = vmul.f32 %v1453_v35, %v1435_v57  ;;  %v1413_v35 = vld [vmem:[%s1855_s7] ss:$0 sm:$0xff] }
 0x369   :  { %v746_v36 = vpack.c.bf16 %v738_v33, %v738_v33 }
 0x36a   :  { %v748_v43 = vpack.c.bf16 %v740_v39, %v740_v39 }
 0x36b   :  { %v764_v40 = vunpack.c.l.b16 %v746_v36 }
 0x36c   :  { %v792_v46 = vunpack.c.l.b16 %v748_v43 }
 0x36d   :  { %v766_v41 = vpack.c.b16 %v765_v37, %v764_v40 }
 0x36e   :  { %v1455_v42 = vpop.eup %1454 }
 0x36f   :  { %v741_v44 = vmul.f32 %v1455_v42, %v1439_v63  ;;  %1324 = vmatmul.msk.bf16.vlgmr.msra.gmra.mxu0 %vm657_vm12, %v766_v41 }
 0x371   :  { %v749_v45 = vpack.c.bf16 %v741_v44, %v741_v44 }
 0x373   :  { %v793_v38 = vunpack.c.l.b16 %v749_v45 }
 0x375   :  { %v794_v47 = vpack.c.b16 %v793_v38, %v792_v46 }
 0x377   :  { %1325 = vmatmul.msk.bf16.vlgmr.msrb.gmra.mxu1 %vm657_vm12, %v794_v47 }
 0x3ea   :  { %v841_v56 = vpop.f32.mrf.mxu2 }
 0x3eb   :  { %v869_v57 = vpop.f32.mrf.mxu3  ;;  %v882_v59 = vpack.c.bf16 %v841_v56, %v841_v56 }
 0x3ec   :  { %v785_v58 = vpop.f32.mrf.mxu0  ;;  %v884_v60 = vpack.c.bf16 %v869_v57, %v869_v57 }
 0x3ed   :  { %v878_v62 = vpack.c.bf16 %v785_v58, %v785_v58  ;;  %v939_v6 = vunpack.c.l.b16 %v882_v59 }
 0x3ee   :  { %v964_v9 = vunpack.c.l.b16 %v884_v60 }
 0x3ef   :  { %v888_v12 = vunpack.c.l.b16 %v878_v62 }
 0x3f2   :  { %v843_v61 = vpop.f32.mrf.mxu2 }
 0x3f3   :  { %v883_v63 = vpack.c.bf16 %v843_v61, %v843_v61  ;;  %v871_v1 = vpop.f32.mrf.mxu3  ;;  %v1398_v61 = vld [vmem:[%s1858_s10 + $0x8] sm:$0xff] }
 0x3f4   :  { %v885_v3 = vpack.c.bf16 %v871_v1, %v871_v1  ;;  %v787_v4 = vpop.f32.mrf.mxu0  ;;  %v813_v5 = vpop.f32.mrf.mxu1  ;;  %1095 = vmatpush.bf16.msra.mxu0 %v1398_v61  ;;  %v1397_v1 = vld [vmem:[%s1858_s10] sm:$0xff] }
 0x3f5   :  { %v940_v7 = vunpack.c.l.b16 %v883_v63  ;;  %v879_v8 = vpack.c.bf16 %v787_v4, %v787_v4  ;;  %v880_v17 = vpack.c.bf16 %v813_v5, %v813_v5 }
 0x3f6   :  { %v965_v11 = vunpack.c.l.b16 %v885_v3  ;;  %v1406_v3 = vld [vmem:[%s1860_s12 + $0x38] sm:$0xff] }
 0x3f7   :  { %v941_v13 = vpack.c.b16 %v940_v7, %v939_v6  ;;  %v889_v14 = vunpack.c.l.b16 %v879_v8  ;;  %v914_v21 = vunpack.c.l.b16 %v880_v17  ;;  %1170 = vmatpush.bf16.msrb.mxu1 %v1406_v3  ;;  %v1405_v6 = vld [vmem:[%s1860_s12 + $0x30] sm:$0xff] }
 0x3f8   :  { %v966_v15 = vpack.c.b16 %v965_v11, %v964_v9  ;;  %1096 = vmatpush.bf16.msra.mxu0 %v1397_v1  ;;  %v1404_v11 = vld [vmem:[%s1860_s12 + $0x28] sm:$0xff] }
 0x3f9   :  { %v890_v16 = vpack.c.b16 %v889_v14, %v888_v12  ;;  %1330 = vmatmul.msk.bf16.vlgmr.msra.gmra.mxu2 %vm511_vm8, %v941_v13 }
 0x3fa   :  { %1331 = vmatmul.msk.bf16.vlgmr.msrb.gmra.mxu3 %vm511_vm8, %v966_v15 }
 0x3fb   :  { %1328 = vmatmul.msk.bf16.vlgmr.msrb.gmra.mxu0 %vm511_vm8, %v890_v16  ;;  %1171 = vmatpush.bf16.msrb.mxu1 %v1405_v6 }
 0x3fc   :  { %v815_v18 = vpop.f32.mrf.mxu1 }
 0x3fd   :  { %v881_v19 = vpack.c.bf16 %v815_v18, %v815_v18 }
 0x3ff   :  { %v915_v20 = vunpack.c.l.b16 %v881_v19  ;;  %1172 = vmatpush.bf16.msrb.mxu1 %v1404_v11 }
 0x401   :  { %v916_v22 = vpack.c.b16 %v915_v20, %v914_v21 }
 0x403   :  { %1329 = vmatmul.msk.bf16.vlgmr.msra.gmra.mxu1 %vm511_vm8, %v916_v22  ;;  %v1414_v22 = vld [vmem:[%s1856_s8] ss:$0 sm:$0xff] }
 0x478   :  { %v907_v23 = vpop.f32.mrf.mxu0 }
 0x479   :  { %v987_v27 = vsel %vm53_vm0, %v907_v23, 0.0 }
 0x47c   :  { %v957_v24 = vpop.f32.mrf.mxu2 }
 0x47d   :  { %v982_v25 = vpop.f32.mrf.mxu3  ;;  %v990_v30 = vsel %vm53_vm0, %v957_v24, 0.0 }
 0x47e   :  { %v992_v32 = vsel %vm53_vm0, %v982_v25, 0.0 }
 0x480   :  { %v932_v26 = vpop.f32.mrf.mxu1  ;;  %v909_v33 = vpop.f32.mrf.mxu0 }
 0x481   :  { %v988_v28 = vsel %vm53_vm0, %v932_v26, 0.0  ;;  %v994_v39 = vsel %vm53_vm0, %v909_v33, 0.0  ;;  %v1415_v26 = vld [vmem:[%s1857_s9] ss:$0 sm:$0xff]  ;;  %v1402_v33 = vld [vmem:[%s1860_s12 + $0x18] sm:$0xff] }
 0x482   :  { %v989_v29 = vadd.f32 %v988_v28, %v987_v27 }
 0x484   :  { %v991_v31 = vadd.f32 %v990_v30, %v989_v29  ;;  %v959_v36 = vpop.f32.mrf.mxu2 }
 0x485   :  { %v984_v42 = vpop.f32.mrf.mxu3  ;;  %v997_v45 = vsel %vm53_vm0, %v959_v36, 0.0  ;;  %v1399_v36 = vld [vmem:[%s1860_s12] sm:$0xff] }
 0x486   :  { %v993_v34 = vadd.f32 %v992_v32, %v991_v31  ;;  %v999_v47 = vsel %vm53_vm0, %v984_v42, 0.0 }
 0x488   :  { %v934_v37 = vpop.f32.mrf.mxu1  ;;  %v1001_v40 = vadd.f32 %v993_v34, %v1568_v0  ;;  %v1401_v34 = vld [vmem:[%s1860_s12 + $0x10] sm:$0xff] }
 0x489   :  { %v995_v41 = vsel %vm53_vm0, %v934_v37, 0.0 }
 0x48a   :  { %v996_v43 = vadd.f32 %v995_v41, %v994_v39  ;;  %v1779_v44 = vadd.f32 %v1413_v35, %v1001_v40  ;;  %v1416_v40 = vld [vmem:[%s1859_s11] ss:$0 sm:$0xff] }
 0x48c   :  { %v998_v46 = vadd.f32 %v997_v45, %v996_v43  ;;  %v1011_v38 = vsel %vm53_vm0, %v1779_v44, 0.0 }
 0x48d   :  { %1012 = vadd.xlane.f32.xlu2 %v1011_v38  ;;  %v1417_v38 = vld [vmem:[%s1861_s13] ss:$0 sm:$0xff]  ;;  %s1488_s13 = smov 128  }
 0x48e   :  { %v1000_v48 = vadd.f32 %v999_v47, %v998_v46 }
 0x490   :  { %v1002_v0 = vadd.f32 %v1000_v48, %v1575_v2 }
 0x492   :  { %v1786_v49 = vadd.f32 %v1413_v35, %v1002_v0  ;;  %v1400_v35 = vld [vmem:[%s1860_s12 + $0x8] sm:$0xff] }
 0x494   :  { %v1014_v50 = vsel %vm53_vm0, %v1786_v49, 0.0 }
 0x495   :  { %1015 = vadd.xlane.f32.xlu0 %v1014_v50 }
 0x500   :  { %v1013_v51 = vpop.xlane.xlu2 %1012 }
 0x501   :  { %v1017_v52 = vmul.f32 %v1013_v51, %v1579_v10 }
 0x503   :  { %v1019_v53 = vsub.f32 %v1779_v44, %v1017_v52 }
 0x505   :  { %v1021_v54 = vmul.f32 %v1019_v53, %v1019_v53 }
 0x507   :  { %v1023_v55 = vsel %vm53_vm0, %v1021_v54, 0.0 }
 0x508   :  { %1024 = vadd.xlane.f32.xlu1 %v1023_v55  ;;  %v1016_v56 = vpop.xlane.xlu0 %1015 }
 0x509   :  { %v1018_v57 = vmul.f32 %v1016_v56, %v1579_v10 }
 0x50b   :  { %v1020_v2 = vsub.f32 %v1786_v49, %v1018_v57 }
 0x50d   :  { %v1022_v58 = vmul.f32 %v1020_v2, %v1020_v2 }
 0x50f   :  { %v1026_v59 = vsel %vm53_vm0, %v1022_v58, 0.0 }
 0x510   :  { %1027 = vadd.xlane.f32.xlu2 %v1026_v59 }
 0x57b   :  { %v1025_v60 = vpop.xlane.xlu1 %1024 }
 0x57c   :  { %v1029_v62 = vmul.f32 %v1025_v60, %v1579_v10 }
 0x57e   :  { %v1031_v63 = vadd.f32 1e-05, %v1029_v62 }
 0x580   :  { %1456 = vrsqrt.f32 %v1031_v63  ;;  %vm1039_vm3 = vweird.f32 %v1031_v63 }
 0x583   :  { %v1028_v4 = vpop.xlane.xlu2 %1027 }
 0x584   :  { %v1030_v5 = vmul.f32 %v1028_v4, %v1579_v10  ;;  %v1403_v10 = vld [vmem:[%s1860_s12 + $0x20] sm:$0xff]  ;;  %s1487_s12 = smov [#allocation2]  }
 0x585   :  { %1173 = vmatpush.bf16.msrb.mxu1 %v1403_v10  ;;  %s1198_s18 = sshll.u32 %s1487_s12, 4  ;;  %s1199_s18 = int_to_ptr.vmem [resolvable:$true] %s1198_s18 }
 0x586   :  { %v1457_v7 = vpop.eup %1456  ;;  %v1032_v8 = vadd.f32 1e-05, %v1030_v5 }
 0x587   :  { %v1034_v9 = vmul.f32 %v1457_v7, %v1031_v63  ;;  %vm1040_vm2 = vweird.f32 %v1457_v7 }
 0x588   :  { %1458 = vrsqrt.f32 %v1032_v8  ;;  %vm1041_vm4 = vmor %vm1039_vm3, %vm1040_vm2  ;;  %vm1049_vm6 = vweird.f32 %v1032_v8 }
 0x589   :  { %v1035_v12 = vmul.f32 %v1457_v7, %v1034_v9  ;;  %1174 = vmatpush.bf16.msrb.mxu1 %v1402_v33 }
 0x58b   :  { %v1036_v13 = vmul.f32 0.5, %v1035_v12 }
 0x58d   :  { %v1037_v14 = vsub.f32 1.5, %v1036_v13  ;;  %1175 = vmatpush.bf16.msrb.mxu1 %v1401_v34 }
 0x58e   :  { %v1459_v15 = vpop.eup %1458 }
 0x58f   :  { %v1038_v16 = vmul.f32 %v1457_v7, %v1037_v14  ;;  %v1044_v17 = vmul.f32 %v1459_v15, %v1032_v8  ;;  %vm1050_vm5 = vweird.f32 %v1459_v15 }
 0x590   :  { %vm1051_vm7 = vmor %vm1049_vm6, %vm1050_vm5 }
 0x591   :  { %v1045_v18 = vmul.f32 %v1459_v15, %v1044_v17  ;;  %v1042_v19 = vsel %vm1041_vm4, %v1457_v7, %v1038_v16  ;;  %1176 = vmatpush.bf16.msrb.mxu1 %v1400_v35 }
 0x592   :  { %v1053_v23 = vmul.f32 %v1042_v19, %v1019_v53 }
 0x593   :  { %v1046_v21 = vmul.f32 0.5, %v1045_v18 }
 0x594   :  { %v1058_v27 = vmul.f32 %v1414_v22, %v1053_v23 }
 0x595   :  { %v1047_v20 = vsub.f32 1.5, %v1046_v21  ;;  %1177 = vmatpush.bf16.msrb.mxu1 %v1399_v36 }
 0x596   :  { %v1063_v30 = vadd.f32 %v1415_v26, %v1058_v27 }
 0x597   :  { %v1048_v24 = vmul.f32 %v1459_v15, %v1047_v20 }
 0x599   :  { %v1052_v25 = vsel %vm1051_vm7, %v1459_v15, %v1048_v24 }
 0x59a   :  { %v1054_v28 = vmul.f32 %v1052_v25, %v1020_v2 }
 0x59c   :  { %v1059_v29 = vmul.f32 %v1414_v22, %v1054_v28 }
 0x59e   :  { %v1064_v31 = vadd.f32 %v1415_v26, %v1059_v29 }
 0x5a0   :  { %v1069_v32 = vpack.c.bf16 %v1064_v31, %v1063_v30 }
 0x5a2   :  { %1340 = vmatmul.msk.bf16.vlgmr.msra.gmra.mxu0 %vm53_vm0, %v1069_v32 }
 0x61f   :  { %v1098_v37 = vpop.f32.mrf.mxu0 }
 0x620   :  { %v1099_v39 = vadd.f32 %v1416_v40, %v1098_v37 }
 0x622   :  { %v1103_v43 = vmax.f32 %v1099_v39, 0.0 }
 0x627   :  { %v1100_v41 = vpop.f32.mrf.mxu0 }
 0x628   :  { %v1101_v42 = vadd.f32 %v1416_v40, %v1100_v41 }
 0x62a   :  { %v1104_v45 = vmax.f32 %v1101_v42, 0.0 }
 0x62c   :  { %v1121_v46 = vpack.c.bf16 %v1104_v45, %v1103_v43 }
 0x62e   :  { %1178 = vmatmul.bf16.vlgmr.msrb.gmra.mxu1 %v1121_v46 }
 0x6ab   :  { %v1179_v47 = vpop.f32.mrf.mxu1 }
 0x6ac   :  { %v1184_v48 = vadd.f32 %v1179_v47, %v1779_v44 }
 0x6ae   :  { %v1190_v0 = vadd.f32 %v1417_v38, %v1184_v48 }
 0x6b0   :  { %1192 = vst.msk [vmem:[#allocation2] sm:$0xff] %vm53_vm0, %v1190_v0 }
 0x6b3   :  { %v1181_v50 = vpop.f32.mrf.mxu1 }
 0x6b4   :  { %v1185_v51 = vadd.f32 %v1181_v50, %v1786_v49 }
 0x6b6   :  { %v1191_v52 = vadd.f32 %v1417_v38, %v1185_v51 }
 0x6b8   :  { %1193 = vst.msk [vmem:[#allocation2 + $0x8] sm:$0xff] %vm53_vm0, %v1191_v52 }
 0x6b9   :  { %1206 = dma.vmem_to_hbm [thread:$0]  %s1199_s18, 256, %s1201_s20, [#allocation3], %s1488_s13, %s1488_s13, %s1489_s21  }
 0x6ba   :  { %1484 = dma.done.wait [#allocation3], 256  }
 0x6bb   :  { %1485 = vsyncadd [#allocation3], 4294967040 }
 0x6bc   :  { %1211 = vsyncpa [#allocation3], 1 }

</bundles_post_ra>
